<compile_context>
chip_gen: v7x
topology: tpu7x:2x2x1
jax: 0.10.0
libtpu: 0.0.40
codegen_flags: <defaults>
</compile_context>

<pallas_src>
import functools

import jax
import jax.numpy as jnp
from jax.experimental import pallas as pl
from jax.experimental.pallas import tpu as pltpu


def _round_up(v: int, m: int) -> int:
    return ((v + m - 1) // m) * m


def _vmem_capacity_bytes() -> int:
    try:
        return int(pltpu.get_tpu_info().vmem_capacity_bytes)
    except Exception:
        return 64 * 1024 * 1024  # conservative default (v7x per-TC VMEM)


def _pick_seq_tiles(S, n_in, m_itemsize, target_m_block_bytes):
    """Pick (Ta, Sa_pad, Tc, Sc_pad) so typical S needs zero padding of m."""
    sub_gran = max(8, 32 // max(1, m_itemsize))   # 8 for f32, 16 for bf16, ...
    # Lane (a) axis of the mT / output blocks.
    if S <= 256:
        ta, sa_pad = S, S                          # full extent: legal, no padding
    else:
        sa_pad = _round_up(S, 128)
        ta = 256 if sa_pad % 256 == 0 else 128
    # Sublane (c) axis: size the m block towards the per-generation target.
    tc_target = max(sub_gran,
                    target_m_block_bytes // max(1, n_in * ta * m_itemsize))
    if S <= tc_target:
        tc, sc_pad = S, S                          # full extent: no padding
    else:
        sc_pad = _round_up(S, sub_gran)
        tc = sub_gran
        for cand in range(sub_gran, sc_pad + 1, sub_gran):
            if sc_pad % cand == 0 and cand <= tc_target:
                tc = cand
    return ta, sa_pad, tc, sc_pad


def _kb_kernel(xwT_ref, y_ref, mT_ref, out_ref):
    # Per grid step:
    #   xwT_ref : (J, Ta)        f32   xw^T[j, a] for the current (b, o, a-tile)
    #   y_ref   : (Tc, J)        f32   y_cat rows for the current (b, c-tile)
    #   mT_ref  : (n_in, Tc, Ta) caller dtype; mT[j, c, a] = m[b, a, c, j]
    #   out_ref : (Tc, Ta)             s^T tile (wrapper swaps axes back)
    n_in = mT_ref.shape[0]

    # Base term on the MXU (bias_y row j == n_in enters through y_cat here):
    #   acc[c, a] = sum_j y_cat[c, j] * xw[a, j]
    acc = jnp.dot(y_ref[...], xwT_ref[...], preferred_element_type=jnp.float32)

    # Knowledge term: per-j VPU FMA on lane-dense (Tc, Ta) slabs.
    # m has no bias column, so the loop bound n_in naturally excludes j == n_in.
    # (A stride-0 sublane-broadcast read of the xw row was considered; the plain
    #  (1, Ta) row multiply is kept because the whole loop stays hidden under the
    #  dominant m DMA and this path is the proven-to-lower one.)
    def body(j, acc):
        row = xwT_ref[pl.ds(j, 1), :]                       # (1, Ta)
        return acc + mT_ref[j].astype(jnp.float32) * row    # (Tc, Ta)

    if n_in <= 64:
        unroll = True                                        # full unroll
    else:
        unroll = next(d for d in (8, 4, 2, 1) if n_in % d == 0)
    acc = jax.lax.fori_loop(0, n_in, body, acc, unroll=unroll)

    out_ref[...] = acc.astype(out_ref.dtype)


@functools.partial(jax.jit, static_argnames=("bias_x", "bias_y"))
def knowledge_biaffine(x, y, m, weight, bias_x=True, bias_y=True):
    """Pallas implementation of KnowledgeBiaffine.forward."""
    B, S, n_in = x.shape
    O = weight.shape[0]
    I = n_in + int(bias_x)
    J = n_in + int(bias_y)
    assert weight.shape == (O, I, J), weight.shape
    assert y.shape == (B, S, n_in) and m.shape == (B, S, S, n_in)

    out_dtype = jnp.result_type(x.dtype, y.dtype, m.dtype, weight.dtype)

    # Small tensors run in f32 (cheap).  m keeps the caller dtype: it is the
    # dominant HBM stream and is upcast per-slab inside the kernel.
    xf = x.astype(jnp.float32)
    yf = y.astype(jnp.float32)
    wf = weight.astype(jnp.float32)
    x_cat = jnp.concatenate([xf, jnp.ones_like(xf[..., :1])], -1) if bias_x else xf
    y_cat = jnp.concatenate([yf, jnp.ones_like(yf[..., :1])], -1) if bias_y else yf

    # ---- generation-aware tiling ------------------------------------------
    vmem_cap = _vmem_capacity_bytes()
    m_isz = jnp.dtype(m.dtype).itemsize
    target_m_block = max(4 << 20, min(16 << 20, vmem_cap // 8))
    Ta, Sa_pad, Tc, Sc_pad = _pick_seq_tiles(S, n_in, m_isz, target_m_block)
    A, C = Sa_pad // Ta, Sc_pad // Tc

    # ---- wrapper-side glue (everything small except the single m transpose) -
    # xw^T[b, o, j, a] = sum_i x_cat[b, a, i] * W[o, i, j]
    xwT = jnp.einsum('bai,oij->boja', x_cat, wf)
    xwT = jnp.pad(xwT, ((0, 0), (0, 0), (0, 0), (0, Sa_pad - S)))
    yp = jnp.pad(y_cat, ((0, 0), (0, Sc_pad - S), (0, 0)))
    # Single transpose of m, kept in the caller dtype; pad widths are zero for
    # typical S so this stays one fused copy (no separate pad pass).
    mT = jnp.transpose(m, (0, 3, 2, 1))
    mT = jnp.pad(mT, ((0, 0), (0, 0), (0, Sc_pad - S), (0, Sa_pad - S)))

    # ---- VMEM budget / cost hints -------------------------------------------
    out_isz = jnp.dtype(out_dtype).itemsize
    blk_bytes = (J * Ta * 4 + Tc * J * 4
                 + n_in * Tc * Ta * m_isz + Tc * Ta * out_isz)
    vmem_limit = int(min(max(32 << 20, 2 * blk_bytes + (4 << 20)),
                         max(32 << 20, int(0.9 * vmem_cap))))
    flops = 2 * B * O * Sa_pad * Sc_pad * (J + n_in)
    bytes_accessed = int(m_isz * mT.size + 4 * (xwT.size + yp.size)
                         + out_isz * B * O * Sc_pad * Sa_pad)

    out_t = pl.pallas_call(
        _kb_kernel,
        out_shape=jax.ShapeDtypeStruct((B, O, Sc_pad, Sa_pad), out_dtype),
        grid=(B, A, C, O),
        in_specs=[
            pl.BlockSpec((pl.Squeezed(), pl.Squeezed(), J, Ta),
                         lambda b, a, c, o: (b, o, 0, a)),
            pl.BlockSpec((pl.Squeezed(), Tc, J),
                         lambda b, a, c, o: (b, c, 0)),
            pl.BlockSpec((pl.Squeezed(), n_in, Tc, Ta),
                         lambda b, a, c, o: (b, 0, c, a)),
        ],
        out_specs=pl.BlockSpec((pl.Squeezed(), pl.Squeezed(), Tc, Ta),
                               lambda b, a, c, o: (b, o, c, a)),
        compiler_params=pltpu.CompilerParams(
            dimension_semantics=("parallel", "parallel", "parallel", "arbitrary"),
            vmem_limit_bytes=vmem_limit),
        cost_estimate=pl.CostEstimate(flops=flops, transcendentals=0,
                                      bytes_accessed=bytes_accessed),
    )(xwT, yp, mT)

    # Kernel produces s^T tiles; swap back and drop sequence padding (no-ops for
    # typical S).  Matches torch `s.squeeze(1)`.
    s = jnp.swapaxes(out_t[:, :, :S, :S], -1, -2)
    if O == 1:
        s = s[:, 0]
    return s


def _reference(x, y, m, weight, bias_x=True, bias_y=True):
    """Pure-JAX transcription of the PyTorch forward (for verification)."""
    B, S, _ = x.shape
    y_st = jnp.broadcast_to(y[:, None, :, :], (B, S, S, y.shape[-1])) + m
    if bias_x:
        x = jnp.concatenate([x, jnp.ones_like(x[..., :1])], axis=-1)
    if bias_y:
        y_st = jnp.concatenate([y_st, jnp.ones_like(y_st[..., :1])], axis=-1)
    x_tmp = jnp.einsum('bxi,oij->boxj', x, weight)           # [B, O, S, J]
    s = jnp.einsum('boaj,bacj->boac', x_tmp, y_st)           # [B, O, S, S]
    if weight.shape[0] == 1:
        s = s.squeeze(1)
    return s


if __name__ == "__main__":
    def run_case(key, B, S, n_in, n_out, bias_x, bias_y, dtype=jnp.float32,
                 tol=2e-3):
        kx, ky, km, kw = jax.random.split(key, 4)
        x = jax.random.normal(kx, (B, S, n_in), dtype=jnp.float32).astype(dtype)
        y = jax.random.normal(ky, (B, S, n_in), dtype=jnp.float32).astype(dtype)
        m = jax.random.normal(km, (B, S, S, n_in), dtype=jnp.float32).astype(dtype)
        I = n_in + int(bias_x)
        J = n_in + int(bias_y)
        # reset_parameters() zeros the weight; use a nonzero init for a real check.
        w = (0.1 * jax.random.normal(kw, (n_out, I, J), dtype=jnp.float32)).astype(dtype)

        out = jax.block_until_ready(
            knowledge_biaffine(x, y, m, w, bias_x=bias_x, bias_y=bias_y))
        ref = _reference(x.astype(jnp.float32), y.astype(jnp.float32),
                         m.astype(jnp.float32), w.astype(jnp.float32),
                         bias_x=bias_x, bias_y=bias_y)

        expected = (B, S, S) if n_out == 1 else (B, n_out, S, S)
        assert out.shape == expected, (out.shape, expected)
        err = float(jnp.max(jnp.abs(out.astype(jnp.float32) - ref)))
        assert jnp.allclose(out.astype(jnp.float32), ref, atol=tol, rtol=tol), err

    key = jax.random.PRNGKey(0)
    k1, k2, k3 = jax.random.split(key, 3)
    # Small canonical case (module defaults: O=1, both biases), f32.
    run_case(k1, B=2, S=8, n_in=32, n_out=1, bias_x=True, bias_y=True)
    # Non-128 sequence length (full-extent tiles, no padding), O > 1, bias_x=False.
    run_case(k2, B=1, S=136, n_in=24, n_out=2, bias_x=False, bias_y=True)
    # bf16 inputs: m stays bf16 through the kernel DMA (dominant-stream savings),
    # f32 accumulation inside the kernel.
    run_case(k3, B=1, S=16, n_in=16, n_out=1, bias_x=True, bias_y=True,
             dtype=jnp.bfloat16, tol=5e-2)

    print("KERNEL_OK")
</pallas_src>

<mosaic_0001>
module attributes {stable_mosaic.version = 11 : i64} {
  func.func @_kb_kernel(%arg0: i32, %arg1: i32, %arg2: i32, %arg3: i32, %arg4: memref<1x1x33x8xf32, #tpu.memory_space<vmem>>, %arg5: memref<1x8x33xf32, #tpu.memory_space<vmem>>, %arg6: memref<1x32x8x8xf32, #tpu.memory_space<vmem>>, %arg7: memref<1x1x8x8xf32, #tpu.memory_space<vmem>>) attributes {dimension_semantics = [#tpu.dimension_semantics<parallel>, #tpu.dimension_semantics<parallel>, #tpu.dimension_semantics<parallel>, #tpu.dimension_semantics<arbitrary>], iteration_bounds = array<i64: 2, 1, 1, 1>, scalar_prefetch = 0 : i64, scratch_operands = 0 : i64, tpu.core_type = #tpu.core_type<tc>, window_params = [{transform_indices = @transform_0, window_bounds = array<i64: 1, 1, 33, 8>}, {transform_indices = @transform_1, window_bounds = array<i64: 1, 8, 33>}, {transform_indices = @transform_2, window_bounds = array<i64: 1, 32, 8, 8>}, {transform_indices = @transform_3, window_bounds = array<i64: 1, 1, 8, 8>}]} {
    %c0 = arith.constant 0 : index
    %c0_0 = arith.constant 0 : index
    %c0_1 = arith.constant 0 : index
    %0 = vector.load %arg5[%c0, %c0_0, %c0_1] : memref<1x8x33xf32, #tpu.memory_space<vmem>>, vector<1x8x33xf32>
    %1 = vector.shape_cast %0 : vector<1x8x33xf32> to vector<8x33xf32>
    %c0_2 = arith.constant 0 : index
    %c0_3 = arith.constant 0 : index
    %c0_4 = arith.constant 0 : index
    %c0_5 = arith.constant 0 : index
    %2 = vector.load %arg4[%c0_2, %c0_3, %c0_4, %c0_5] : memref<1x1x33x8xf32, #tpu.memory_space<vmem>>, vector<1x1x33x8xf32>
    %3 = vector.shape_cast %2 : vector<1x1x33x8xf32> to vector<33x8xf32>
    %cst = arith.constant dense<0.000000e+00> : vector<8x8xf32>
    %4 = tpu.matmul %1, %3, %cst {dimension_numbers = #tpu.dot_dimension_numbers<[1], [0], [0], [1], [0, 0, 1, 1], [], []>} : vector<8x33xf32>, vector<33x8xf32>, vector<8x8xf32> -> vector<8x8xf32>
    %c0_i32 = arith.constant 0 : i32
    %c0_6 = arith.constant 0 : index
    %c0_7 = arith.constant 0 : index
    %5 = arith.index_cast %c0_i32 : i32 to index
    %c0_8 = arith.constant 0 : index
    %6 = vector.load %arg4[%c0_6, %c0_7, %5, %c0_8] : memref<1x1x33x8xf32, #tpu.memory_space<vmem>>, vector<1x1x1x8xf32>
    %7 = vector.shape_cast %6 : vector<1x1x1x8xf32> to vector<1x8xf32>
    %c0_9 = arith.constant 0 : index
    %8 = arith.index_cast %c0_i32 : i32 to index
    %c0_10 = arith.constant 0 : index
    %c0_11 = arith.constant 0 : index
    %9 = vector.load %arg6[%c0_9, %8, %c0_10, %c0_11] : memref<1x32x8x8xf32, #tpu.memory_space<vmem>>, vector<1x1x8x8xf32>
    %10 = vector.shape_cast %9 : vector<1x1x8x8xf32> to vector<8x8xf32>
    %11 = vector.broadcast %7 : vector<1x8xf32> to vector<8x8xf32>
    %12 = arith.mulf %10, %11 : vector<8x8xf32>
    %13 = arith.addf %4, %12 : vector<8x8xf32>
    %c1_i32 = arith.constant 1 : i32
    %c0_12 = arith.constant 0 : index
    %c0_13 = arith.constant 0 : index
    %14 = arith.index_cast %c1_i32 : i32 to index
    %c0_14 = arith.constant 0 : index
    %15 = vector.load %arg4[%c0_12, %c0_13, %14, %c0_14] : memref<1x1x33x8xf32, #tpu.memory_space<vmem>>, vector<1x1x1x8xf32>
    %16 = vector.shape_cast %15 : vector<1x1x1x8xf32> to vector<1x8xf32>
    %c0_15 = arith.constant 0 : index
    %17 = arith.index_cast %c1_i32 : i32 to index
    %c0_16 = arith.constant 0 : index
    %c0_17 = arith.constant 0 : index
    %18 = vector.load %arg6[%c0_15, %17, %c0_16, %c0_17] : memref<1x32x8x8xf32, #tpu.memory_space<vmem>>, vector<1x1x8x8xf32>
    %19 = vector.shape_cast %18 : vector<1x1x8x8xf32> to vector<8x8xf32>
    %20 = vector.broadcast %16 : vector<1x8xf32> to vector<8x8xf32>
    %21 = arith.mulf %19, %20 : vector<8x8xf32>
    %22 = arith.addf %13, %21 : vector<8x8xf32>
    %c2_i32 = arith.constant 2 : i32
    %c0_18 = arith.constant 0 : index
    %c0_19 = arith.constant 0 : index
    %23 = arith.index_cast %c2_i32 : i32 to index
    %c0_20 = arith.constant 0 : index
    %24 = vector.load %arg4[%c0_18, %c0_19, %23, %c0_20] : memref<1x1x33x8xf32, #tpu.memory_space<vmem>>, vector<1x1x1x8xf32>
    %25 = vector.shape_cast %24 : vector<1x1x1x8xf32> to vector<1x8xf32>
    %c0_21 = arith.constant 0 : index
    %26 = arith.index_cast %c2_i32 : i32 to index
    %c0_22 = arith.constant 0 : index
    %c0_23 = arith.constant 0 : index
    %27 = vector.load %arg6[%c0_21, %26, %c0_22, %c0_23] : memref<1x32x8x8xf32, #tpu.memory_space<vmem>>, vector<1x1x8x8xf32>
    %28 = vector.shape_cast %27 : vector<1x1x8x8xf32> to vector<8x8xf32>
    %29 = vector.broadcast %25 : vector<1x8xf32> to vector<8x8xf32>
    %30 = arith.mulf %28, %29 : vector<8x8xf32>
    %31 = arith.addf %22, %30 : vector<8x8xf32>
    %c3_i32 = arith.constant 3 : i32
    %c0_24 = arith.constant 0 : index
    %c0_25 = arith.constant 0 : index
    %32 = arith.index_cast %c3_i32 : i32 to index
    %c0_26 = arith.constant 0 : index
    %33 = vector.load %arg4[%c0_24, %c0_25, %32, %c0_26] : memref<1x1x33x8xf32, #tpu.memory_space<vmem>>, vector<1x1x1x8xf32>
    %34 = vector.shape_cast %33 : vector<1x1x1x8xf32> to vector<1x8xf32>
    %c0_27 = arith.constant 0 : index
    %35 = arith.index_cast %c3_i32 : i32 to index
    %c0_28 = arith.constant 0 : index
    %c0_29 = arith.constant 0 : index
    %36 = vector.load %arg6[%c0_27, %35, %c0_28, %c0_29] : memref<1x32x8x8xf32, #tpu.memory_space<vmem>>, vector<1x1x8x8xf32>
    %37 = vector.shape_cast %36 : vector<1x1x8x8xf32> to vector<8x8xf32>
    %38 = vector.broadcast %34 : vector<1x8xf32> to vector<8x8xf32>
    %39 = arith.mulf %37, %38 : vector<8x8xf32>
    %40 = arith.addf %31, %39 : vector<8x8xf32>
    %c4_i32 = arith.constant 4 : i32
    %c0_30 = arith.constant 0 : index
    %c0_31 = arith.constant 0 : index
    %41 = arith.index_cast %c4_i32 : i32 to index
    %c0_32 = arith.constant 0 : index
    %42 = vector.load %arg4[%c0_30, %c0_31, %41, %c0_32] : memref<1x1x33x8xf32, #tpu.memory_space<vmem>>, vector<1x1x1x8xf32>
    %43 = vector.shape_cast %42 : vector<1x1x1x8xf32> to vector<1x8xf32>
    %c0_33 = arith.constant 0 : index
    %44 = arith.index_cast %c4_i32 : i32 to index
    %c0_34 = arith.constant 0 : index
    %c0_35 = arith.constant 0 : index
    %45 = vector.load %arg6[%c0_33, %44, %c0_34, %c0_35] : memref<1x32x8x8xf32, #tpu.memory_space<vmem>>, vector<1x1x8x8xf32>
    %46 = vector.shape_cast %45 : vector<1x1x8x8xf32> to vector<8x8xf32>
    %47 = vector.broadcast %43 : vector<1x8xf32> to vector<8x8xf32>
    %48 = arith.mulf %46, %47 : vector<8x8xf32>
    %49 = arith.addf %40, %48 : vector<8x8xf32>
    %c5_i32 = arith.constant 5 : i32
    %c0_36 = arith.constant 0 : index
    %c0_37 = arith.constant 0 : index
    %50 = arith.index_cast %c5_i32 : i32 to index
    %c0_38 = arith.constant 0 : index
    %51 = vector.load %arg4[%c0_36, %c0_37, %50, %c0_38] : memref<1x1x33x8xf32, #tpu.memory_space<vmem>>, vector<1x1x1x8xf32>
    %52 = vector.shape_cast %51 : vector<1x1x1x8xf32> to vector<1x8xf32>
    %c0_39 = arith.constant 0 : index
    %53 = arith.index_cast %c5_i32 : i32 to index
    %c0_40 = arith.constant 0 : index
    %c0_41 = arith.constant 0 : index
    %54 = vector.load %arg6[%c0_39, %53, %c0_40, %c0_41] : memref<1x32x8x8xf32, #tpu.memory_space<vmem>>, vector<1x1x8x8xf32>
    %55 = vector.shape_cast %54 : vector<1x1x8x8xf32> to vector<8x8xf32>
    %56 = vector.broadcast %52 : vector<1x8xf32> to vector<8x8xf32>
    %57 = arith.mulf %55, %56 : vector<8x8xf32>
    %58 = arith.addf %49, %57 : vector<8x8xf32>
    %c6_i32 = arith.constant 6 : i32
    %c0_42 = arith.constant 0 : index
    %c0_43 = arith.constant 0 : index
    %59 = arith.index_cast %c6_i32 : i32 to index
    %c0_44 = arith.constant 0 : index
    %60 = vector.load %arg4[%c0_42, %c0_43, %59, %c0_44] : memref<1x1x33x8xf32, #tpu.memory_space<vmem>>, vector<1x1x1x8xf32>
    %61 = vector.shape_cast %60 : vector<1x1x1x8xf32> to vector<1x8xf32>
    %c0_45 = arith.constant 0 : index
    %62 = arith.index_cast %c6_i32 : i32 to index
    %c0_46 = arith.constant 0 : index
    %c0_47 = arith.constant 0 : index
    %63 = vector.load %arg6[%c0_45, %62, %c0_46, %c0_47] : memref<1x32x8x8xf32, #tpu.memory_space<vmem>>, vector<1x1x8x8xf32>
    %64 = vector.shape_cast %63 : vector<1x1x8x8xf32> to vector<8x8xf32>
    %65 = vector.broadcast %61 : vector<1x8xf32> to vector<8x8xf32>
    %66 = arith.mulf %64, %65 : vector<8x8xf32>
    %67 = arith.addf %58, %66 : vector<8x8xf32>
    %c7_i32 = arith.constant 7 : i32
    %c0_48 = arith.constant 0 : index
    %c0_49 = arith.constant 0 : index
    %68 = arith.index_cast %c7_i32 : i32 to index
    %c0_50 = arith.constant 0 : index
    %69 = vector.load %arg4[%c0_48, %c0_49, %68, %c0_50] : memref<1x1x33x8xf32, #tpu.memory_space<vmem>>, vector<1x1x1x8xf32>
    %70 = vector.shape_cast %69 : vector<1x1x1x8xf32> to vector<1x8xf32>
    %c0_51 = arith.constant 0 : index
    %71 = arith.index_cast %c7_i32 : i32 to index
    %c0_52 = arith.constant 0 : index
    %c0_53 = arith.constant 0 : index
    %72 = vector.load %arg6[%c0_51, %71, %c0_52, %c0_53] : memref<1x32x8x8xf32, #tpu.memory_space<vmem>>, vector<1x1x8x8xf32>
    %73 = vector.shape_cast %72 : vector<1x1x8x8xf32> to vector<8x8xf32>
    %74 = vector.broadcast %70 : vector<1x8xf32> to vector<8x8xf32>
    %75 = arith.mulf %73, %74 : vector<8x8xf32>
    %76 = arith.addf %67, %75 : vector<8x8xf32>
    %c8_i32 = arith.constant 8 : i32
    %c0_54 = arith.constant 0 : index
    %c0_55 = arith.constant 0 : index
    %77 = arith.index_cast %c8_i32 : i32 to index
    %c0_56 = arith.constant 0 : index
    %78 = vector.load %arg4[%c0_54, %c0_55, %77, %c0_56] : memref<1x1x33x8xf32, #tpu.memory_space<vmem>>, vector<1x1x1x8xf32>
    %79 = vector.shape_cast %78 : vector<1x1x1x8xf32> to vector<1x8xf32>
    %c0_57 = arith.constant 0 : index
    %80 = arith.index_cast %c8_i32 : i32 to index
    %c0_58 = arith.constant 0 : index
    %c0_59 = arith.constant 0 : index
    %81 = vector.load %arg6[%c0_57, %80, %c0_58, %c0_59] : memref<1x32x8x8xf32, #tpu.memory_space<vmem>>, vector<1x1x8x8xf32>
    %82 = vector.shape_cast %81 : vector<1x1x8x8xf32> to vector<8x8xf32>
    %83 = vector.broadcast %79 : vector<1x8xf32> to vector<8x8xf32>
    %84 = arith.mulf %82, %83 : vector<8x8xf32>
    %85 = arith.addf %76, %84 : vector<8x8xf32>
    %c9_i32 = arith.constant 9 : i32
    %c0_60 = arith.constant 0 : index
    %c0_61 = arith.constant 0 : index
    %86 = arith.index_cast %c9_i32 : i32 to index
    %c0_62 = arith.constant 0 : index
    %87 = vector.load %arg4[%c0_60, %c0_61, %86, %c0_62] : memref<1x1x33x8xf32, #tpu.memory_space<vmem>>, vector<1x1x1x8xf32>
    %88 = vector.shape_cast %87 : vector<1x1x1x8xf32> to vector<1x8xf32>
    %c0_63 = arith.constant 0 : index
    %89 = arith.index_cast %c9_i32 : i32 to index
    %c0_64 = arith.constant 0 : index
    %c0_65 = arith.constant 0 : index
    %90 = vector.load %arg6[%c0_63, %89, %c0_64, %c0_65] : memref<1x32x8x8xf32, #tpu.memory_space<vmem>>, vector<1x1x8x8xf32>
    %91 = vector.shape_cast %90 : vector<1x1x8x8xf32> to vector<8x8xf32>
    %92 = vector.broadcast %88 : vector<1x8xf32> to vector<8x8xf32>
    %93 = arith.mulf %91, %92 : vector<8x8xf32>
    %94 = arith.addf %85, %93 : vector<8x8xf32>
    %c10_i32 = arith.constant 10 : i32
    %c0_66 = arith.constant 0 : index
    %c0_67 = arith.constant 0 : index
    %95 = arith.index_cast %c10_i32 : i32 to index
    %c0_68 = arith.constant 0 : index
    %96 = vector.load %arg4[%c0_66, %c0_67, %95, %c0_68] : memref<1x1x33x8xf32, #tpu.memory_space<vmem>>, vector<1x1x1x8xf32>
    %97 = vector.shape_cast %96 : vector<1x1x1x8xf32> to vector<1x8xf32>
    %c0_69 = arith.constant 0 : index
    %98 = arith.index_cast %c10_i32 : i32 to index
    %c0_70 = arith.constant 0 : index
    %c0_71 = arith.constant 0 : index
    %99 = vector.load %arg6[%c0_69, %98, %c0_70, %c0_71] : memref<1x32x8x8xf32, #tpu.memory_space<vmem>>, vector<1x1x8x8xf32>
    %100 = vector.shape_cast %99 : vector<1x1x8x8xf32> to vector<8x8xf32>
    %101 = vector.broadcast %97 : vector<1x8xf32> to vector<8x8xf32>
    %102 = arith.mulf %100, %101 : vector<8x8xf32>
    %103 = arith.addf %94, %102 : vector<8x8xf32>
    %c11_i32 = arith.constant 11 : i32
    %c0_72 = arith.constant 0 : index
    %c0_73 = arith.constant 0 : index
    %104 = arith.index_cast %c11_i32 : i32 to index
    %c0_74 = arith.constant 0 : index
    %105 = vector.load %arg4[%c0_72, %c0_73, %104, %c0_74] : memref<1x1x33x8xf32, #tpu.memory_space<vmem>>, vector<1x1x1x8xf32>
    %106 = vector.shape_cast %105 : vector<1x1x1x8xf32> to vector<1x8xf32>
    %c0_75 = arith.constant 0 : index
    %107 = arith.index_cast %c11_i32 : i32 to index
    %c0_76 = arith.constant 0 : index
    %c0_77 = arith.constant 0 : index
    %108 = vector.load %arg6[%c0_75, %107, %c0_76, %c0_77] : memref<1x32x8x8xf32, #tpu.memory_space<vmem>>, vector<1x1x8x8xf32>
    %109 = vector.shape_cast %108 : vector<1x1x8x8xf32> to vector<8x8xf32>
    %110 = vector.broadcast %106 : vector<1x8xf32> to vector<8x8xf32>
    %111 = arith.mulf %109, %110 : vector<8x8xf32>
    %112 = arith.addf %103, %111 : vector<8x8xf32>
    %c12_i32 = arith.constant 12 : i32
    %c0_78 = arith.constant 0 : index
    %c0_79 = arith.constant 0 : index
    %113 = arith.index_cast %c12_i32 : i32 to index
    %c0_80 = arith.constant 0 : index
    %114 = vector.load %arg4[%c0_78, %c0_79, %113, %c0_80] : memref<1x1x33x8xf32, #tpu.memory_space<vmem>>, vector<1x1x1x8xf32>
    %115 = vector.shape_cast %114 : vector<1x1x1x8xf32> to vector<1x8xf32>
    %c0_81 = arith.constant 0 : index
    %116 = arith.index_cast %c12_i32 : i32 to index
    %c0_82 = arith.constant 0 : index
    %c0_83 = arith.constant 0 : index
    %117 = vector.load %arg6[%c0_81, %116, %c0_82, %c0_83] : memref<1x32x8x8xf32, #tpu.memory_space<vmem>>, vector<1x1x8x8xf32>
    %118 = vector.shape_cast %117 : vector<1x1x8x8xf32> to vector<8x8xf32>
    %119 = vector.broadcast %115 : vector<1x8xf32> to vector<8x8xf32>
    %120 = arith.mulf %118, %119 : vector<8x8xf32>
    %121 = arith.addf %112, %120 : vector<8x8xf32>
    %c13_i32 = arith.constant 13 : i32
    %c0_84 = arith.constant 0 : index
    %c0_85 = arith.constant 0 : index
    %122 = arith.index_cast %c13_i32 : i32 to index
    %c0_86 = arith.constant 0 : index
    %123 = vector.load %arg4[%c0_84, %c0_85, %122, %c0_86] : memref<1x1x33x8xf32, #tpu.memory_space<vmem>>, vector<1x1x1x8xf32>
    %124 = vector.shape_cast %123 : vector<1x1x1x8xf32> to vector<1x8xf32>
    %c0_87 = arith.constant 0 : index
    %125 = arith.index_cast %c13_i32 : i32 to index
    %c0_88 = arith.constant 0 : index
    %c0_89 = arith.constant 0 : index
    %126 = vector.load %arg6[%c0_87, %125, %c0_88, %c0_89] : memref<1x32x8x8xf32, #tpu.memory_space<vmem>>, vector<1x1x8x8xf32>
    %127 = vector.shape_cast %126 : vector<1x1x8x8xf32> to vector<8x8xf32>
    %128 = vector.broadcast %124 : vector<1x8xf32> to vector<8x8xf32>
    %129 = arith.mulf %127, %128 : vector<8x8xf32>
    %130 = arith.addf %121, %129 : vector<8x8xf32>
    %c14_i32 = arith.constant 14 : i32
    %c0_90 = arith.constant 0 : index
    %c0_91 = arith.constant 0 : index
    %131 = arith.index_cast %c14_i32 : i32 to index
    %c0_92 = arith.constant 0 : index
    %132 = vector.load %arg4[%c0_90, %c0_91, %131, %c0_92] : memref<1x1x33x8xf32, #tpu.memory_space<vmem>>, vector<1x1x1x8xf32>
    %133 = vector.shape_cast %132 : vector<1x1x1x8xf32> to vector<1x8xf32>
    %c0_93 = arith.constant 0 : index
    %134 = arith.index_cast %c14_i32 : i32 to index
    %c0_94 = arith.constant 0 : index
    %c0_95 = arith.constant 0 : index
    %135 = vector.load %arg6[%c0_93, %134, %c0_94, %c0_95] : memref<1x32x8x8xf32, #tpu.memory_space<vmem>>, vector<1x1x8x8xf32>
    %136 = vector.shape_cast %135 : vector<1x1x8x8xf32> to vector<8x8xf32>
    %137 = vector.broadcast %133 : vector<1x8xf32> to vector<8x8xf32>
    %138 = arith.mulf %136, %137 : vector<8x8xf32>
    %139 = arith.addf %130, %138 : vector<8x8xf32>
    %c15_i32 = arith.constant 15 : i32
    %c0_96 = arith.constant 0 : index
    %c0_97 = arith.constant 0 : index
    %140 = arith.index_cast %c15_i32 : i32 to index
    %c0_98 = arith.constant 0 : index
    %141 = vector.load %arg4[%c0_96, %c0_97, %140, %c0_98] : memref<1x1x33x8xf32, #tpu.memory_space<vmem>>, vector<1x1x1x8xf32>
    %142 = vector.shape_cast %141 : vector<1x1x1x8xf32> to vector<1x8xf32>
    %c0_99 = arith.constant 0 : index
    %143 = arith.index_cast %c15_i32 : i32 to index
    %c0_100 = arith.constant 0 : index
    %c0_101 = arith.constant 0 : index
    %144 = vector.load %arg6[%c0_99, %143, %c0_100, %c0_101] : memref<1x32x8x8xf32, #tpu.memory_space<vmem>>, vector<1x1x8x8xf32>
    %145 = vector.shape_cast %144 : vector<1x1x8x8xf32> to vector<8x8xf32>
    %146 = vector.broadcast %142 : vector<1x8xf32> to vector<8x8xf32>
    %147 = arith.mulf %145, %146 : vector<8x8xf32>
    %148 = arith.addf %139, %147 : vector<8x8xf32>
    %c16_i32 = arith.constant 16 : i32
    %c0_102 = arith.constant 0 : index
    %c0_103 = arith.constant 0 : index
    %149 = arith.index_cast %c16_i32 : i32 to index
    %c0_104 = arith.constant 0 : index
    %150 = vector.load %arg4[%c0_102, %c0_103, %149, %c0_104] : memref<1x1x33x8xf32, #tpu.memory_space<vmem>>, vector<1x1x1x8xf32>
    %151 = vector.shape_cast %150 : vector<1x1x1x8xf32> to vector<1x8xf32>
    %c0_105 = arith.constant 0 : index
    %152 = arith.index_cast %c16_i32 : i32 to index
    %c0_106 = arith.constant 0 : index
    %c0_107 = arith.constant 0 : index
    %153 = vector.load %arg6[%c0_105, %152, %c0_106, %c0_107] : memref<1x32x8x8xf32, #tpu.memory_space<vmem>>, vector<1x1x8x8xf32>
    %154 = vector.shape_cast %153 : vector<1x1x8x8xf32> to vector<8x8xf32>
    %155 = vector.broadcast %151 : vector<1x8xf32> to vector<8x8xf32>
    %156 = arith.mulf %154, %155 : vector<8x8xf32>
    %157 = arith.addf %148, %156 : vector<8x8xf32>
    %c17_i32 = arith.constant 17 : i32
    %c0_108 = arith.constant 0 : index
    %c0_109 = arith.constant 0 : index
    %158 = arith.index_cast %c17_i32 : i32 to index
    %c0_110 = arith.constant 0 : index
    %159 = vector.load %arg4[%c0_108, %c0_109, %158, %c0_110] : memref<1x1x33x8xf32, #tpu.memory_space<vmem>>, vector<1x1x1x8xf32>
    %160 = vector.shape_cast %159 : vector<1x1x1x8xf32> to vector<1x8xf32>
    %c0_111 = arith.constant 0 : index
    %161 = arith.index_cast %c17_i32 : i32 to index
    %c0_112 = arith.constant 0 : index
    %c0_113 = arith.constant 0 : index
    %162 = vector.load %arg6[%c0_111, %161, %c0_112, %c0_113] : memref<1x32x8x8xf32, #tpu.memory_space<vmem>>, vector<1x1x8x8xf32>
    %163 = vector.shape_cast %162 : vector<1x1x8x8xf32> to vector<8x8xf32>
    %164 = vector.broadcast %160 : vector<1x8xf32> to vector<8x8xf32>
    %165 = arith.mulf %163, %164 : vector<8x8xf32>
    %166 = arith.addf %157, %165 : vector<8x8xf32>
    %c18_i32 = arith.constant 18 : i32
    %c0_114 = arith.constant 0 : index
    %c0_115 = arith.constant 0 : index
    %167 = arith.index_cast %c18_i32 : i32 to index
    %c0_116 = arith.constant 0 : index
    %168 = vector.load %arg4[%c0_114, %c0_115, %167, %c0_116] : memref<1x1x33x8xf32, #tpu.memory_space<vmem>>, vector<1x1x1x8xf32>
    %169 = vector.shape_cast %168 : vector<1x1x1x8xf32> to vector<1x8xf32>
    %c0_117 = arith.constant 0 : index
    %170 = arith.index_cast %c18_i32 : i32 to index
    %c0_118 = arith.constant 0 : index
    %c0_119 = arith.constant 0 : index
    %171 = vector.load %arg6[%c0_117, %170, %c0_118, %c0_119] : memref<1x32x8x8xf32, #tpu.memory_space<vmem>>, vector<1x1x8x8xf32>
    %172 = vector.shape_cast %171 : vector<1x1x8x8xf32> to vector<8x8xf32>
    %173 = vector.broadcast %169 : vector<1x8xf32> to vector<8x8xf32>
    %174 = arith.mulf %172, %173 : vector<8x8xf32>
    %175 = arith.addf %166, %174 : vector<8x8xf32>
    %c19_i32 = arith.constant 19 : i32
    %c0_120 = arith.constant 0 : index
    %c0_121 = arith.constant 0 : index
    %176 = arith.index_cast %c19_i32 : i32 to index
    %c0_122 = arith.constant 0 : index
    %177 = vector.load %arg4[%c0_120, %c0_121, %176, %c0_122] : memref<1x1x33x8xf32, #tpu.memory_space<vmem>>, vector<1x1x1x8xf32>
    %178 = vector.shape_cast %177 : vector<1x1x1x8xf32> to vector<1x8xf32>
    %c0_123 = arith.constant 0 : index
    %179 = arith.index_cast %c19_i32 : i32 to index
    %c0_124 = arith.constant 0 : index
    %c0_125 = arith.constant 0 : index
    %180 = vector.load %arg6[%c0_123, %179, %c0_124, %c0_125] : memref<1x32x8x8xf32, #tpu.memory_space<vmem>>, vector<1x1x8x8xf32>
    %181 = vector.shape_cast %180 : vector<1x1x8x8xf32> to vector<8x8xf32>
    %182 = vector.broadcast %178 : vector<1x8xf32> to vector<8x8xf32>
    %183 = arith.mulf %181, %182 : vector<8x8xf32>
    %184 = arith.addf %175, %183 : vector<8x8xf32>
    %c20_i32 = arith.constant 20 : i32
    %c0_126 = arith.constant 0 : index
    %c0_127 = arith.constant 0 : index
    %185 = arith.index_cast %c20_i32 : i32 to index
    %c0_128 = arith.constant 0 : index
    %186 = vector.load %arg4[%c0_126, %c0_127, %185, %c0_128] : memref<1x1x33x8xf32, #tpu.memory_space<vmem>>, vector<1x1x1x8xf32>
    %187 = vector.shape_cast %186 : vector<1x1x1x8xf32> to vector<1x8xf32>
    %c0_129 = arith.constant 0 : index
    %188 = arith.index_cast %c20_i32 : i32 to index
    %c0_130 = arith.constant 0 : index
    %c0_131 = arith.constant 0 : index
    %189 = vector.load %arg6[%c0_129, %188, %c0_130, %c0_131] : memref<1x32x8x8xf32, #tpu.memory_space<vmem>>, vector<1x1x8x8xf32>
    %190 = vector.shape_cast %189 : vector<1x1x8x8xf32> to vector<8x8xf32>
    %191 = vector.broadcast %187 : vector<1x8xf32> to vector<8x8xf32>
    %192 = arith.mulf %190, %191 : vector<8x8xf32>
    %193 = arith.addf %184, %192 : vector<8x8xf32>
    %c21_i32 = arith.constant 21 : i32
    %c0_132 = arith.constant 0 : index
    %c0_133 = arith.constant 0 : index
    %194 = arith.index_cast %c21_i32 : i32 to index
    %c0_134 = arith.constant 0 : index
    %195 = vector.load %arg4[%c0_132, %c0_133, %194, %c0_134] : memref<1x1x33x8xf32, #tpu.memory_space<vmem>>, vector<1x1x1x8xf32>
    %196 = vector.shape_cast %195 : vector<1x1x1x8xf32> to vector<1x8xf32>
    %c0_135 = arith.constant 0 : index
    %197 = arith.index_cast %c21_i32 : i32 to index
    %c0_136 = arith.constant 0 : index
    %c0_137 = arith.constant 0 : index
    %198 = vector.load %arg6[%c0_135, %197, %c0_136, %c0_137] : memref<1x32x8x8xf32, #tpu.memory_space<vmem>>, vector<1x1x8x8xf32>
    %199 = vector.shape_cast %198 : vector<1x1x8x8xf32> to vector<8x8xf32>
    %200 = vector.broadcast %196 : vector<1x8xf32> to vector<8x8xf32>
    %201 = arith.mulf %199, %200 : vector<8x8xf32>
    %202 = arith.addf %193, %201 : vector<8x8xf32>
    %c22_i32 = arith.constant 22 : i32
    %c0_138 = arith.constant 0 : index
    %c0_139 = arith.constant 0 : index
    %203 = arith.index_cast %c22_i32 : i32 to index
    %c0_140 = arith.constant 0 : index
    %204 = vector.load %arg4[%c0_138, %c0_139, %203, %c0_140] : memref<1x1x33x8xf32, #tpu.memory_space<vmem>>, vector<1x1x1x8xf32>
    %205 = vector.shape_cast %204 : vector<1x1x1x8xf32> to vector<1x8xf32>
    %c0_141 = arith.constant 0 : index
    %206 = arith.index_cast %c22_i32 : i32 to index
    %c0_142 = arith.constant 0 : index
    %c0_143 = arith.constant 0 : index
    %207 = vector.load %arg6[%c0_141, %206, %c0_142, %c0_143] : memref<1x32x8x8xf32, #tpu.memory_space<vmem>>, vector<1x1x8x8xf32>
    %208 = vector.shape_cast %207 : vector<1x1x8x8xf32> to vector<8x8xf32>
    %209 = vector.broadcast %205 : vector<1x8xf32> to vector<8x8xf32>
    %210 = arith.mulf %208, %209 : vector<8x8xf32>
    %211 = arith.addf %202, %210 : vector<8x8xf32>
    %c23_i32 = arith.constant 23 : i32
    %c0_144 = arith.constant 0 : index
    %c0_145 = arith.constant 0 : index
    %212 = arith.index_cast %c23_i32 : i32 to index
    %c0_146 = arith.constant 0 : index
    %213 = vector.load %arg4[%c0_144, %c0_145, %212, %c0_146] : memref<1x1x33x8xf32, #tpu.memory_space<vmem>>, vector<1x1x1x8xf32>
    %214 = vector.shape_cast %213 : vector<1x1x1x8xf32> to vector<1x8xf32>
    %c0_147 = arith.constant 0 : index
    %215 = arith.index_cast %c23_i32 : i32 to index
    %c0_148 = arith.constant 0 : index
    %c0_149 = arith.constant 0 : index
    %216 = vector.load %arg6[%c0_147, %215, %c0_148, %c0_149] : memref<1x32x8x8xf32, #tpu.memory_space<vmem>>, vector<1x1x8x8xf32>
    %217 = vector.shape_cast %216 : vector<1x1x8x8xf32> to vector<8x8xf32>
    %218 = vector.broadcast %214 : vector<1x8xf32> to vector<8x8xf32>
    %219 = arith.mulf %217, %218 : vector<8x8xf32>
    %220 = arith.addf %211, %219 : vector<8x8xf32>
    %c24_i32 = arith.constant 24 : i32
    %c0_150 = arith.constant 0 : index
    %c0_151 = arith.constant 0 : index
    %221 = arith.index_cast %c24_i32 : i32 to index
    %c0_152 = arith.constant 0 : index
    %222 = vector.load %arg4[%c0_150, %c0_151, %221, %c0_152] : memref<1x1x33x8xf32, #tpu.memory_space<vmem>>, vector<1x1x1x8xf32>
    %223 = vector.shape_cast %222 : vector<1x1x1x8xf32> to vector<1x8xf32>
    %c0_153 = arith.constant 0 : index
    %224 = arith.index_cast %c24_i32 : i32 to index
    %c0_154 = arith.constant 0 : index
    %c0_155 = arith.constant 0 : index
    %225 = vector.load %arg6[%c0_153, %224, %c0_154, %c0_155] : memref<1x32x8x8xf32, #tpu.memory_space<vmem>>, vector<1x1x8x8xf32>
    %226 = vector.shape_cast %225 : vector<1x1x8x8xf32> to vector<8x8xf32>
    %227 = vector.broadcast %223 : vector<1x8xf32> to vector<8x8xf32>
    %228 = arith.mulf %226, %227 : vector<8x8xf32>
    %229 = arith.addf %220, %228 : vector<8x8xf32>
    %c25_i32 = arith.constant 25 : i32
    %c0_156 = arith.constant 0 : index
    %c0_157 = arith.constant 0 : index
    %230 = arith.index_cast %c25_i32 : i32 to index
    %c0_158 = arith.constant 0 : index
    %231 = vector.load %arg4[%c0_156, %c0_157, %230, %c0_158] : memref<1x1x33x8xf32, #tpu.memory_space<vmem>>, vector<1x1x1x8xf32>
    %232 = vector.shape_cast %231 : vector<1x1x1x8xf32> to vector<1x8xf32>
    %c0_159 = arith.constant 0 : index
    %233 = arith.index_cast %c25_i32 : i32 to index
    %c0_160 = arith.constant 0 : index
    %c0_161 = arith.constant 0 : index
    %234 = vector.load %arg6[%c0_159, %233, %c0_160, %c0_161] : memref<1x32x8x8xf32, #tpu.memory_space<vmem>>, vector<1x1x8x8xf32>
    %235 = vector.shape_cast %234 : vector<1x1x8x8xf32> to vector<8x8xf32>
    %236 = vector.broadcast %232 : vector<1x8xf32> to vector<8x8xf32>
    %237 = arith.mulf %235, %236 : vector<8x8xf32>
    %238 = arith.addf %229, %237 : vector<8x8xf32>
    %c26_i32 = arith.constant 26 : i32
    %c0_162 = arith.constant 0 : index
    %c0_163 = arith.constant 0 : index
    %239 = arith.index_cast %c26_i32 : i32 to index
    %c0_164 = arith.constant 0 : index
    %240 = vector.load %arg4[%c0_162, %c0_163, %239, %c0_164] : memref<1x1x33x8xf32, #tpu.memory_space<vmem>>, vector<1x1x1x8xf32>
    %241 = vector.shape_cast %240 : vector<1x1x1x8xf32> to vector<1x8xf32>
    %c0_165 = arith.constant 0 : index
    %242 = arith.index_cast %c26_i32 : i32 to index
    %c0_166 = arith.constant 0 : index
    %c0_167 = arith.constant 0 : index
    %243 = vector.load %arg6[%c0_165, %242, %c0_166, %c0_167] : memref<1x32x8x8xf32, #tpu.memory_space<vmem>>, vector<1x1x8x8xf32>
    %244 = vector.shape_cast %243 : vector<1x1x8x8xf32> to vector<8x8xf32>
    %245 = vector.broadcast %241 : vector<1x8xf32> to vector<8x8xf32>
    %246 = arith.mulf %244, %245 : vector<8x8xf32>
    %247 = arith.addf %238, %246 : vector<8x8xf32>
    %c27_i32 = arith.constant 27 : i32
    %c0_168 = arith.constant 0 : index
    %c0_169 = arith.constant 0 : index
    %248 = arith.index_cast %c27_i32 : i32 to index
    %c0_170 = arith.constant 0 : index
    %249 = vector.load %arg4[%c0_168, %c0_169, %248, %c0_170] : memref<1x1x33x8xf32, #tpu.memory_space<vmem>>, vector<1x1x1x8xf32>
    %250 = vector.shape_cast %249 : vector<1x1x1x8xf32> to vector<1x8xf32>
    %c0_171 = arith.constant 0 : index
    %251 = arith.index_cast %c27_i32 : i32 to index
    %c0_172 = arith.constant 0 : index
    %c0_173 = arith.constant 0 : index
    %252 = vector.load %arg6[%c0_171, %251, %c0_172, %c0_173] : memref<1x32x8x8xf32, #tpu.memory_space<vmem>>, vector<1x1x8x8xf32>
    %253 = vector.shape_cast %252 : vector<1x1x8x8xf32> to vector<8x8xf32>
    %254 = vector.broadcast %250 : vector<1x8xf32> to vector<8x8xf32>
    %255 = arith.mulf %253, %254 : vector<8x8xf32>
    %256 = arith.addf %247, %255 : vector<8x8xf32>
    %c28_i32 = arith.constant 28 : i32
    %c0_174 = arith.constant 0 : index
    %c0_175 = arith.constant 0 : index
    %257 = arith.index_cast %c28_i32 : i32 to index
    %c0_176 = arith.constant 0 : index
    %258 = vector.load %arg4[%c0_174, %c0_175, %257, %c0_176] : memref<1x1x33x8xf32, #tpu.memory_space<vmem>>, vector<1x1x1x8xf32>
    %259 = vector.shape_cast %258 : vector<1x1x1x8xf32> to vector<1x8xf32>
    %c0_177 = arith.constant 0 : index
    %260 = arith.index_cast %c28_i32 : i32 to index
    %c0_178 = arith.constant 0 : index
    %c0_179 = arith.constant 0 : index
    %261 = vector.load %arg6[%c0_177, %260, %c0_178, %c0_179] : memref<1x32x8x8xf32, #tpu.memory_space<vmem>>, vector<1x1x8x8xf32>
    %262 = vector.shape_cast %261 : vector<1x1x8x8xf32> to vector<8x8xf32>
    %263 = vector.broadcast %259 : vector<1x8xf32> to vector<8x8xf32>
    %264 = arith.mulf %262, %263 : vector<8x8xf32>
    %265 = arith.addf %256, %264 : vector<8x8xf32>
    %c29_i32 = arith.constant 29 : i32
    %c0_180 = arith.constant 0 : index
    %c0_181 = arith.constant 0 : index
    %266 = arith.index_cast %c29_i32 : i32 to index
    %c0_182 = arith.constant 0 : index
    %267 = vector.load %arg4[%c0_180, %c0_181, %266, %c0_182] : memref<1x1x33x8xf32, #tpu.memory_space<vmem>>, vector<1x1x1x8xf32>
    %268 = vector.shape_cast %267 : vector<1x1x1x8xf32> to vector<1x8xf32>
    %c0_183 = arith.constant 0 : index
    %269 = arith.index_cast %c29_i32 : i32 to index
    %c0_184 = arith.constant 0 : index
    %c0_185 = arith.constant 0 : index
    %270 = vector.load %arg6[%c0_183, %269, %c0_184, %c0_185] : memref<1x32x8x8xf32, #tpu.memory_space<vmem>>, vector<1x1x8x8xf32>
    %271 = vector.shape_cast %270 : vector<1x1x8x8xf32> to vector<8x8xf32>
    %272 = vector.broadcast %268 : vector<1x8xf32> to vector<8x8xf32>
    %273 = arith.mulf %271, %272 : vector<8x8xf32>
    %274 = arith.addf %265, %273 : vector<8x8xf32>
    %c30_i32 = arith.constant 30 : i32
    %c0_186 = arith.constant 0 : index
    %c0_187 = arith.constant 0 : index
    %275 = arith.index_cast %c30_i32 : i32 to index
    %c0_188 = arith.constant 0 : index
    %276 = vector.load %arg4[%c0_186, %c0_187, %275, %c0_188] : memref<1x1x33x8xf32, #tpu.memory_space<vmem>>, vector<1x1x1x8xf32>
    %277 = vector.shape_cast %276 : vector<1x1x1x8xf32> to vector<1x8xf32>
    %c0_189 = arith.constant 0 : index
    %278 = arith.index_cast %c30_i32 : i32 to index
    %c0_190 = arith.constant 0 : index
    %c0_191 = arith.constant 0 : index
    %279 = vector.load %arg6[%c0_189, %278, %c0_190, %c0_191] : memref<1x32x8x8xf32, #tpu.memory_space<vmem>>, vector<1x1x8x8xf32>
    %280 = vector.shape_cast %279 : vector<1x1x8x8xf32> to vector<8x8xf32>
    %281 = vector.broadcast %277 : vector<1x8xf32> to vector<8x8xf32>
    %282 = arith.mulf %280, %281 : vector<8x8xf32>
    %283 = arith.addf %274, %282 : vector<8x8xf32>
    %c31_i32 = arith.constant 31 : i32
    %c0_192 = arith.constant 0 : index
    %c0_193 = arith.constant 0 : index
    %284 = arith.index_cast %c31_i32 : i32 to index
    %c0_194 = arith.constant 0 : index
    %285 = vector.load %arg4[%c0_192, %c0_193, %284, %c0_194] : memref<1x1x33x8xf32, #tpu.memory_space<vmem>>, vector<1x1x1x8xf32>
    %286 = vector.shape_cast %285 : vector<1x1x1x8xf32> to vector<1x8xf32>
    %c0_195 = arith.constant 0 : index
    %287 = arith.index_cast %c31_i32 : i32 to index
    %c0_196 = arith.constant 0 : index
    %c0_197 = arith.constant 0 : index
    %288 = vector.load %arg6[%c0_195, %287, %c0_196, %c0_197] : memref<1x32x8x8xf32, #tpu.memory_space<vmem>>, vector<1x1x8x8xf32>
    %289 = vector.shape_cast %288 : vector<1x1x8x8xf32> to vector<8x8xf32>
    %290 = vector.broadcast %286 : vector<1x8xf32> to vector<8x8xf32>
    %291 = arith.mulf %289, %290 : vector<8x8xf32>
    %292 = arith.addf %283, %291 : vector<8x8xf32>
    %c32_i32 = arith.constant 32 : i32
    %c0_198 = arith.constant 0 : index
    %c0_199 = arith.constant 0 : index
    %c0_200 = arith.constant 0 : index
    %c0_201 = arith.constant 0 : index
    %293 = vector.load %arg7[%c0_198, %c0_199, %c0_200, %c0_201] : memref<1x1x8x8xf32, #tpu.memory_space<vmem>>, vector<1x1x8x8xf32>
    %294 = vector.shape_cast %293 : vector<1x1x8x8xf32> to vector<8x8xf32>
    %295 = vector.shape_cast %292 : vector<8x8xf32> to vector<1x1x8x8xf32>
    tpu.vector_store %arg7[%c0_198, %c0_199, %c0_200, %c0_201], %295 {strides = array<i32>} : memref<1x1x8x8xf32, #tpu.memory_space<vmem>>, vector<1x1x8x8xf32>,
    return
  }
  func.func @transform_0(%arg0: i32, %arg1: i32, %arg2: i32, %arg3: i32) -> (i32, i32, i32, i32) {
    %c0_i32 = arith.constant 0 : i32
    %c0_i32_0 = arith.constant 0 : i32
    return %arg0, %arg3, %c0_i32, %arg1 : i32, i32, i32, i32
  }
  func.func @transform_1(%arg0: i32, %arg1: i32, %arg2: i32, %arg3: i32) -> (i32, i32, i32) {
    %c0_i32 = arith.constant 0 : i32
    %c0_i32_0 = arith.constant 0 : i32
    return %arg0, %arg2, %c0_i32 : i32, i32, i32
  }
  func.func @transform_2(%arg0: i32, %arg1: i32, %arg2: i32, %arg3: i32) -> (i32, i32, i32, i32) {
    %c0_i32 = arith.constant 0 : i32
    %c0_i32_0 = arith.constant 0 : i32
    return %arg0, %c0_i32, %arg2, %arg1 : i32, i32, i32, i32
  }
  func.func @transform_3(%arg0: i32, %arg1: i32, %arg2: i32, %arg3: i32) -> (i32, i32, i32, i32) {
    %c0_i32 = arith.constant 0 : i32
    return %arg0, %arg3, %arg2, %arg1 : i32, i32, i32, i32
  }
}

</mosaic_0001>

<bundles_post_ra>
// kernel: knowledge_biaffine.1
= control target key start
LH: loop header
LB: loop body
LE: loop exit
PB: predicated region body
PF: predicated region fallthrough
CT: control target
= control target key end

     0   :  { %s1009_s12 = smov 0   ;;  %s1011_s13 = smov 0   ;;  %s1130_s0 = inlined_call_operand.vmem [shape: f32[2,1,33,8], index: 0, kind: input, shape index: {}]   ;;  %s1131_s1 = inlined_call_operand.vmem [shape: f32[2,8,33], index: 1, kind: input, shape index: {}]   ;;  %s1132_s2 = inlined_call_operand.vmem [shape: f32[2,32,8,8], index: 2, kind: input, shape index: {}]   ;;  %s1133_s3 = inlined_call_operand.vmem [shape: f32[2,1,8,8], index: 3, kind: output, shape index: {}]  }
   0x1   :  { %s1013_s14 = smov 0  }
   0x2 LB: > { %s39_s15 = sadd.s32 1, %s980_s13  ;;  %p835_p0 = scmp.ge.s32.totalorder %s984_s14, 1  ;;  %s984_s14 = sphi %s1013_s14, %s13_s14   ;;  %s980_s13 = sphi %s1011_s13, %s1135_s13   ;;  %s976_s12 = sphi %s1009_s12, %s1134_s12  }
   0x3   : > { %p41_p1 = scmp.ge.s32.totalorder %s39_s15, 2  ;;  %p214_p2 = scmp.lt.s32.totalorder %s984_s14, 3 }
   0x5   : > { %s1137_s15 = smov (%p41_p1, %s39_s15), 0  ;;  %p215_p3 = pnand %p835_p0, %p214_p2 }
   0x6   : > { %p271_p4 = scmp.lt.s32.totalorder (!%p215_p3), %s976_s12, 1  ;;  %v986_v0 = vmov (!%p215_p3), 0.0|0.0   ;;  %vm987_vm0 = vmmov (!%p215_p3), 0   ;;  %v988_v1 = vmov (!%p215_p3), 0.0   ;;  %vm331_vm1 = vcmask (!%p215_p3), 1040384  }
   0x7   : > { %218 = sbr.rel (%p215_p3) target bundleno = 307 (0x133), region = 32  ;;  %928 = vmatprep.subr.bf16.mxu0 (!%p215_p3), %v986_v0  ;;  %925 = vmatprep.mubr.msk.f32.mxu0 (!%p215_p3), %vm987_vm0, %v988_v1  ;;  %vm327_vm2 = vcmask (!%p215_p3), 269312   ;;  %vm684_vm3 = vcmask (!%p215_p3), 64512  }
   0xe   : > { %s1139_s12 = smov (!%p271_p4, %s976_s12), 1 }
   0xf   : > { %s934_s16 = smul.u32 40, %s1139_s12  ;;  %s837_s20 = sshll.u32 %s1139_s12, 3 }
  0x10   : > { %s289_s23 = scalar_lea.vmem %s1131_s1, %s837_s20  ;;  %s908_s24 = sshll.u32 %s1139_s12, 8 }
  0x11   : > { %s1033_s19 = scalar_lea.vmem %s1130_s0, %s934_s16  ;;  %v314_v9 = vld [vmem:[%s289_s23] sm:$0xff]  ;;  %s1050_s27 = scalar_lea.vmem %s1132_s2, %s908_s24 }
  0x12   : > { %v315_v2 = vld [vmem:[%s1033_s19] sm:$0xff]  ;;  %v316_v3 = vld [vmem:[%s1033_s19 + $0x8] sm:$0xff]  ;;  %v317_v4 = vld [vmem:[%s1033_s19 + $0x10] sm:$0xff]  ;;  %s313_s30 = scalar_lea.vmem %s1133_s3, %s837_s20 }
  0x13   : > { %v929_v5 = vpack.c.bf16 %v316_v3, %v315_v2  ;;  %v318_v6 = vld [vmem:[%s1033_s19 + $0x18] sm:$0xff]  ;;  %v319_v8 = vld [vmem:[%s1033_s19 + $0x20] sm:$0x1]  ;;  %v845_v12 = vld [vmem:[%s1033_s19 + $0x1] ss:$0 sm:$0xff] }
  0x14   : > { %v932_v7 = vpack.c.bf16 %v318_v6, %v317_v4  ;;  %v841_v10 = vld [vmem:[%s1033_s19] ss:$0 sm:$0xff]  ;;  %v844_v13 = vld [vmem:[%s1050_s27 + $0x8] sm:$0xff]  ;;  %v847_v15 = vld [vmem:[%s1033_s19 + $0x2] ss:$0 sm:$0xff] }
  0x15   : > { %930 = vmatpush3.bf16.msra.mxu0 %v929_v5  ;;  %v321_v11 = vld [vmem:[%s1050_s27] sm:$0xff]  ;;  %v846_v16 = vld [vmem:[%s1050_s27 + $0x10] sm:$0xff]  ;;  %v412_v17 = vmul.f32 %v845_v12, %v844_v13  ;;  %v848_v20 = vld [vmem:[%s1050_s27 + $0x18] sm:$0xff] }
  0x16   : > { %931 = vmatprep.subr.bf16.mxu0 %v986_v0  ;;  %v326_v14 = vmul.f32 %v841_v10, %v321_v11  ;;  %v849_v19 = vld [vmem:[%s1033_s19 + $0x3] ss:$0 sm:$0xff]  ;;  %v421_v22 = vmul.f32 %v847_v15, %v846_v16  ;;  %v851_v24 = vld [vmem:[%s1033_s19 + $0x4] ss:$0 sm:$0xff]  ;;  %v853_v28 = vld [vmem:[%s1033_s19 + $0x5] ss:$0 sm:$0xff] }
  0x17   : > { %v850_v25 = vld [vmem:[%s1050_s27 + $0x20] sm:$0xff]  ;;  %v430_v27 = vmul.f32 %v849_v19, %v848_v20  ;;  %v852_v29 = vld [vmem:[%s1050_s27 + $0x28] sm:$0xff]  ;;  %v854_v33 = vld [vmem:[%s1050_s27 + $0x30] sm:$0xff] }
  0x18   : > { %v439_v31 = vmul.f32 %v851_v24, %v850_v25  ;;  %v855_v32 = vld [vmem:[%s1033_s19 + $0x6] ss:$0 sm:$0xff]  ;;  %v448_v35 = vmul.f32 %v853_v28, %v852_v29  ;;  %v857_v36 = vld [vmem:[%s1033_s19 + $0x7] ss:$0 sm:$0xff]  ;;  %v856_v37 = vld [vmem:[%s1050_s27 + $0x38] sm:$0xff] }
  0x19   : > { %933 = vmatpush3.bf16.msra.mxu0 %v932_v7  ;;  %v457_v39 = vmul.f32 %v855_v32, %v854_v33  ;;  %v859_v40 = vld [vmem:[%s1033_s19 + $0x8] ss:$0 sm:$0xff]  ;;  %v858_v41 = vld [vmem:[%s1050_s27 + $0x40] sm:$0xff]  ;;  %v466_v43 = vmul.f32 %v857_v36, %v856_v37  ;;  %v861_v44 = vld [vmem:[%s1033_s19 + $0x9] ss:$0 sm:$0xff] }
  0x1a   : > { %923 = vmatprep.subr.mxu0 %v988_v1  ;;  %v860_v45 = vld [vmem:[%s1050_s27 + $0x48] sm:$0xff]  ;;  %v475_v47 = vmul.f32 %v859_v40, %v858_v41  ;;  %v862_v49 = vld [vmem:[%s1050_s27 + $0x50] sm:$0xff]  ;;  %v864_v53 = vld [vmem:[%s1050_s27 + $0x58] sm:$0xff] }
  0x1b   : > { %v863_v48 = vld [vmem:[%s1033_s19 + $0xa] ss:$0 sm:$0xff]  ;;  %v484_v51 = vmul.f32 %v861_v44, %v860_v45  ;;  %v865_v52 = vld [vmem:[%s1033_s19 + $0xb] ss:$0 sm:$0xff]  ;;  %v867_v56 = vld [vmem:[%s1033_s19 + $0xc] ss:$0 sm:$0xff] }
  0x1c   : > { %v493_v55 = vmul.f32 %v863_v48, %v862_v49  ;;  %v866_v57 = vld [vmem:[%s1050_s27 + $0x60] sm:$0xff]  ;;  %v502_v59 = vmul.f32 %v865_v52, %v864_v53  ;;  %v869_v60 = vld [vmem:[%s1033_s19 + $0xd] ss:$0 sm:$0xff]  ;;  %v871_v0 = vld [vmem:[%s1033_s19 + $0xe] ss:$0 sm:$0xff] }
  0x1d   : > { %924 = vmatpush3.msk.msra.mxu0 %vm331_vm1, %v319_v8  ;;  %v868_v61 = vld [vmem:[%s1050_s27 + $0x68] sm:$0xff]  ;;  %v511_v63 = vmul.f32 %v867_v56, %v866_v57  ;;  %v870_v1 = vld [vmem:[%s1050_s27 + $0x70] sm:$0xff]  ;;  %v872_v5 = vld [vmem:[%s1050_s27 + $0x78] sm:$0xff] }
  0x1e   : > { %926 = vmatmul.mubr.msk.f32.vlgmr.msra.gmra.mrb[0].mxu0 %vm327_vm2, %v314_v9  ;;  %v520_v3 = vmul.f32 %v869_v60, %v868_v61  ;;  %v873_v4 = vld [vmem:[%s1033_s19 + $0xf] ss:$0 sm:$0xff]  ;;  %v529_v7 = vmul.f32 %v871_v0, %v870_v1  ;;  %v875_v8 = vld [vmem:[%s1033_s19 + $0x10] ss:$0 sm:$0xff]  ;;  %v874_v9 = vld [vmem:[%s1050_s27 + $0x80] sm:$0xff] }
  0x1f   : > { %v538_v11 = vmul.f32 %v873_v4, %v872_v5  ;;  %v877_v12 = vld [vmem:[%s1033_s19 + $0x11] ss:$0 sm:$0xff]  ;;  %v876_v13 = vld [vmem:[%s1050_s27 + $0x88] sm:$0xff]  ;;  %v547_v15 = vmul.f32 %v875_v8, %v874_v9  ;;  %v879_v16 = vld [vmem:[%s1033_s19 + $0x12] ss:$0 sm:$0xff] }
  0x20   : > { %v556_v19 = vmul.f32 %v877_v12, %v876_v13  ;;  %v881_v20 = vld [vmem:[%s1033_s19 + $0x13] ss:$0 sm:$0xff]  ;;  %v883_v24 = vld [vmem:[%s1033_s19 + $0x14] ss:$0 sm:$0xff]  ;;  %v882_v25 = vld [vmem:[%s1050_s27 + $0xa0] sm:$0xff] }
  0x21   : > { %v885_v28 = vld [vmem:[%s1033_s19 + $0x15] ss:$0 sm:$0xff]  ;;  %v884_v29 = vld [vmem:[%s1050_s27 + $0xa8] sm:$0xff]  ;;  %v887_v32 = vld [vmem:[%s1033_s19 + $0x16] ss:$0 sm:$0xff] }
  0x22   : > { %v886_v33 = vld [vmem:[%s1050_s27 + $0xb0] sm:$0xff]  ;;  %v888_v37 = vld [vmem:[%s1050_s27 + $0xb8] sm:$0xff]  ;;  %v890_v41 = vld [vmem:[%s1050_s27 + $0xc0] sm:$0xff] }
  0x23   : > { %v889_v36 = vld [vmem:[%s1033_s19 + $0x17] ss:$0 sm:$0xff]  ;;  %v891_v40 = vld [vmem:[%s1033_s19 + $0x18] ss:$0 sm:$0xff]  ;;  %v893_v44 = vld [vmem:[%s1033_s19 + $0x19] ss:$0 sm:$0xff] }
  0x24   : > { %v892_v45 = vld [vmem:[%s1050_s27 + $0xc8] sm:$0xff]  ;;  %v895_v48 = vld [vmem:[%s1033_s19 + $0x1a] ss:$0 sm:$0xff]  ;;  %v894_v49 = vld [vmem:[%s1050_s27 + $0xd0] sm:$0xff] }
  0x25   : > { %v897_v52 = vld [vmem:[%s1033_s19 + $0x1b] ss:$0 sm:$0xff]  ;;  %v899_v56 = vld [vmem:[%s1033_s19 + $0x1c] ss:$0 sm:$0xff]  ;;  %v898_v57 = vld [vmem:[%s1050_s27 + $0xe0] sm:$0xff] }
  0x26   : > { %v896_v53 = vld [vmem:[%s1050_s27 + $0xd8] sm:$0xff]  ;;  %v900_v61 = vld [vmem:[%s1050_s27 + $0xe8] sm:$0xff]  ;;  %v902_v1 = vld [vmem:[%s1050_s27 + $0xf0] sm:$0xff] }
  0x27   : > { %v901_v60 = vld [vmem:[%s1033_s19 + $0x1d] ss:$0 sm:$0xff]  ;;  %v903_v0 = vld [vmem:[%s1033_s19 + $0x1e] ss:$0 sm:$0xff]  ;;  %v905_v4 = vld [vmem:[%s1033_s19 + $0x1f] ss:$0 sm:$0xff] }
  0x28   : > { %v904_v5 = vld [vmem:[%s1050_s27 + $0xf8] sm:$0xff] }
  0x29   : > { %v682_v9 = vmul.f32 %v905_v4, %v904_v5 }
  0xf1   : > { %v401_v18 = vpop.f32.mrb[0].mxu0 }
  0xf2   : > { %v402_v21 = vadd.f32 %v401_v18, %v326_v14  ;;  %v927_v23 = vpop.f32.mrb[1].mxu0 }
  0xf4   : > { %v413_v26 = vadd.f32 %v412_v17, %v402_v21  ;;  %v878_v17 = vld [vmem:[%s1050_s27 + $0x90] sm:$0xff]  ;;  %v880_v21 = vld [vmem:[%s1050_s27 + $0x98] sm:$0xff] }
  0xf5   : > { %v565_v23 = vmul.f32 %v879_v16, %v878_v17 }
  0xf6   : > { %v422_v30 = vadd.f32 %v421_v22, %v413_v26 }
  0xf8   : > { %v431_v34 = vadd.f32 %v430_v27, %v422_v30  ;;  %v574_v27 = vmul.f32 %v881_v20, %v880_v21 }
  0xfa   : > { %v440_v38 = vadd.f32 %v439_v31, %v431_v34  ;;  %v583_v31 = vmul.f32 %v883_v24, %v882_v25 }
  0xfc   : > { %v449_v42 = vadd.f32 %v448_v35, %v440_v38  ;;  %v592_v35 = vmul.f32 %v885_v28, %v884_v29 }
  0xfe   : > { %v458_v46 = vadd.f32 %v457_v39, %v449_v42  ;;  %v601_v39 = vmul.f32 %v887_v32, %v886_v33 }
 0x100   : > { %v467_v50 = vadd.f32 %v466_v43, %v458_v46  ;;  %v610_v43 = vmul.f32 %v889_v36, %v888_v37 }
 0x102   : > { %v476_v54 = vadd.f32 %v475_v47, %v467_v50  ;;  %v619_v47 = vmul.f32 %v891_v40, %v890_v41 }
 0x104   : > { %v485_v58 = vadd.f32 %v484_v51, %v476_v54  ;;  %v628_v51 = vmul.f32 %v893_v44, %v892_v45 }
 0x106   : > { %v494_v62 = vadd.f32 %v493_v55, %v485_v58  ;;  %v637_v55 = vmul.f32 %v895_v48, %v894_v49 }
 0x108   : > { %v503_v2 = vadd.f32 %v502_v59, %v494_v62  ;;  %v646_v59 = vmul.f32 %v897_v52, %v896_v53 }
 0x10a   : > { %v512_v6 = vadd.f32 %v511_v63, %v503_v2  ;;  %v655_v63 = vmul.f32 %v899_v56, %v898_v57 }
 0x10c   : > { %v521_v10 = vadd.f32 %v520_v3, %v512_v6  ;;  %v664_v3 = vmul.f32 %v901_v60, %v900_v61 }
 0x10e   : > { %v530_v14 = vadd.f32 %v529_v7, %v521_v10  ;;  %v673_v7 = vmul.f32 %v903_v0, %v902_v1 }
 0x110   : > { %v539_v18 = vadd.f32 %v538_v11, %v530_v14 }
 0x112   : > { %v548_v22 = vadd.f32 %v547_v15, %v539_v18 }
 0x114   : > { %v557_v26 = vadd.f32 %v556_v19, %v548_v22 }
 0x116   : > { %v566_v30 = vadd.f32 %v565_v23, %v557_v26 }
 0x118   : > { %v575_v34 = vadd.f32 %v574_v27, %v566_v30 }
 0x11a   : > { %v584_v38 = vadd.f32 %v583_v31, %v575_v34 }
 0x11c   : > { %v593_v42 = vadd.f32 %v592_v35, %v584_v38 }
 0x11e   : > { %v602_v46 = vadd.f32 %v601_v39, %v593_v42 }
 0x120   : > { %v611_v50 = vadd.f32 %v610_v43, %v602_v46 }
 0x122   : > { %v620_v54 = vadd.f32 %v619_v47, %v611_v50 }
 0x124   : > { %v629_v58 = vadd.f32 %v628_v51, %v620_v54 }
 0x126   : > { %v638_v62 = vadd.f32 %v637_v55, %v629_v58 }
 0x128   : > { %v647_v2 = vadd.f32 %v646_v59, %v638_v62 }
 0x12a   : > { %v656_v6 = vadd.f32 %v655_v63, %v647_v2 }
 0x12c   : > { %v665_v8 = vadd.f32 %v664_v3, %v656_v6 }
 0x12e   : > { %v674_v10 = vadd.f32 %v673_v7, %v665_v8 }
 0x130   : > { %v683_v11 = vadd.f32 %v682_v9, %v674_v10 }
 0x132   : > { %685 = vst.msk [vmem:[%s313_s30] sm:$0xff] %vm684_vm3, %v683_v11 }
 0x133 PF: > { %s13_s14 = sadd.s32 1, %s984_s14   ;;  %s1134_s12 = smov %s980_s13 }
 0x134   : > { %p10_p5 = scmp.ge.s32.totalorder %s13_s14, 4   ;;  %s1135_s13 = smov %s1137_s15 }
 0x136   :  { %12 = sbr.rel (!%p10_p5) target bundleno = 2 (0x2), region = 99 }

</bundles_post_ra>
